<compile_context>
chip_gen: v6e
topology: v6e:2x2x1
jax: 0.10.0
libtpu: 0.0.40
codegen_flags: <defaults>
</compile_context>

<pallas_src>
import math

import jax
import jax.numpy as jnp
from jax.experimental import pallas as pl
from jax.experimental.pallas import tpu as pltpu


def _round_up(x, m):
    return ((x + m - 1) // m) * m


def _gcn_kernel(t_ref, x_ref, w_ref, b_ref, o_ref):
    """One grid step = one V-row tile x one batch group.

    t_ref : (K, Vt, Vp)        T row tile (constant across the batch axis)
    x_ref : (1, Vp, Bt*Din)    vertex-major batch group: x_g[.., w, b*Din+d] = x[b, w, d]
    w_ref : (K, Din, Dout_p)   weights (constant across the whole grid)
    b_ref : (1, Dout_p)        bias
    o_ref : (Bt, Vt, Dout_p)
    """
    K, Vt, Vp = t_ref.shape
    Din = w_ref.shape[1]
    Bt = o_ref.shape[0]

    # Dominant contraction as ONE stacked MXU matmul over the vertex dim:
    #   (K*Vt, Vp) @ (Vp, Bt*Din) -> (K*Vt, Bt*Din).
    # M = K*Vt and N = Bt*Din both fill the MXU even for small Din.
    t2 = t_ref[...].reshape(K * Vt, Vp)          # merge of leading dims: free (Vt % 8 == 0)
    temp = jnp.dot(t2, x_ref[0], preferred_element_type=jnp.float32)
    temp = temp.reshape(K, Vt, Bt * Din)         # leading-dim split: free

    w = w_ref[...]
    bias = b_ref[...].astype(jnp.float32)        # (1, Dout_p), broadcasts over rows
    for b in range(Bt):                          # small static unroll over the batch group
        tb = temp[:, :, b * Din:(b + 1) * Din].astype(w.dtype)     # (K, Vt, Din)
        # sum_k (T_k x_b) @ W_k  as a k-batched matmul followed by a k-sum.
        yb = jnp.einsum("kvd,kdo->kvo", tb, w,
                        preferred_element_type=jnp.float32).sum(axis=0)   # (Vt, Dout_p)
        o_ref[b] = (yb + bias).astype(o_ref.dtype)


@jax.jit
def graph_convolution(x, t_k, weight, bias):
    """x: (B, V, Din), t_k: (K, V, V), weight: (K, Din, Dout), bias: (Dout,)."""
    B, V, Din = x.shape
    K, _, Dout = weight.shape
    dt = x.dtype
    itemsize = x.dtype.itemsize

    # ---- V handling: fully VMEM-resident T vs. V-row-tiled T (v7x VMEM = 64 MiB) ----
    t_res_bytes = K * _round_up(V, 8) * _round_up(V, 8) * t_k.dtype.itemsize
    tile_v = t_res_bytes > (12 << 20)
    if tile_v:
        Vt = 256                        # T row tile; multiple of 128 keeps blocked dims lane-aligned
        Vp = _round_up(V, Vt)
        Dout_p = _round_up(Dout, 128)   # tiled out block last dim must be a lane multiple
    else:
        Vp = _round_up(V, 8)            # sublane alignment; blocks cover the full last two dims
        Vt = Vp
        # Small Dout: keep it unpadded (masked stores < 4x HBM write volume);
        # large Dout: lane-pad for dense vst.
        Dout_p = Dout if Dout <= 128 else _round_up(Dout, 128)

    # ---- batch tile: grow the MXU N dim (Bt*Din lanes) and amortize grid overhead ----
    want_n = max(1, -(-256 // max(Din, 1)))                          # aim for ~256 lanes of N
    cap_out = max(1, (4 << 20) // max(1, Vt * Dout_p * itemsize))     # keep streamed out block ~4 MiB
    cap_x = max(1, (4 << 20) // max(1, Vp * Din * itemsize))          # keep streamed x block ~4 MiB
    Bt = int(max(1, min(B, want_n, cap_out, cap_x)))
    Bp = _round_up(B, Bt)
    nB = Bp // Bt
    nV = Vp // Vt

    # ---- zero padding (exact: padded T cols hit zero x rows; padded rows are sliced off) ----
    t_p = jnp.pad(t_k, ((0, 0), (0, Vp - V), (0, Vp - V)))
    w_p = jnp.pad(weight, ((0, 0), (0, 0), (0, Dout_p - Dout)))
    b_p = jnp.pad(bias, ((0, Dout_p - Dout),)).reshape(1, Dout_p)
    x_p = jnp.pad(x, ((0, Bp - B), (0, Vp - V), (0, 0)))
    # Vertex-major batch groups so the dominant matmul RHS is already (Vp, Bt*Din):
    #   x_g[g, w, b*Din + d] = x[g*Bt + b, w, d]
    x_g = jnp.transpose(x_p.reshape(nB, Bt, Vp, Din), (0, 2, 1, 3)).reshape(nB, Vp, Bt * Din)

    # ---- explicit VMEM budget (resident T/W/bias + double-buffered streamed blocks + f32 temps) ----
    resident = (K * Vt * Vp + K * Din * Dout_p + Dout_p) * itemsize
    streamed = (Vp * Bt * Din + Bt * Vt * Dout_p) * itemsize
    f32_tmp = (K * Vt * Bt * Din + K * Vt * Dout_p + Bt * Vt * Dout_p) * 4
    est = 2 * (resident + streamed) + f32_tmp
    vmem_limit = int(min(max(2 * est, 32 << 20), 64 << 20))

    out_p = pl.pallas_call(
        _gcn_kernel,
        out_shape=jax.ShapeDtypeStruct((Bp, Vp, Dout_p), dt),
        grid_spec=pltpu.PrefetchScalarGridSpec(
            num_scalar_prefetch=0,
            # V-row tiles outer, batch groups inner: the (large) T tile stays put
            # while the (small) x groups stream underneath it.
            grid=(nV, nB),
            in_specs=[
                pl.BlockSpec((K, Vt, Vp), lambda v, b: (0, v, 0)),
                pl.BlockSpec((1, Vp, Bt * Din), lambda v, b: (b, 0, 0)),
                pl.BlockSpec((K, Din, Dout_p), lambda v, b: (0, 0, 0)),
                pl.BlockSpec((1, Dout_p), lambda v, b: (0, 0)),
            ],
            out_specs=pl.BlockSpec((Bt, Vt, Dout_p), lambda v, b: (b, v, 0)),
        ),
        compiler_params=pltpu.CompilerParams(
            dimension_semantics=("parallel", "parallel"),  # disjoint out tiles on both axes
            vmem_limit_bytes=vmem_limit,
        ),
    )(t_p, x_g, w_p, b_p)

    return out_p[:B, :V, :Dout]


def _reference(x, t_k, weight, bias):
    # out[b] = sum_k (T_k[k] @ x[b]) @ W[k] + bias
    temp = jnp.einsum("kvw,bwd->bkvd", t_k, x)
    out = jnp.einsum("bkvd,kde->bve", temp, weight)
    return out + bias


if __name__ == "__main__":
    # Small shapes consistent with the module.
    B, V, D_in, D_out, K = 2, 16, 8, 32, 3

    key = jax.random.PRNGKey(0)
    k_x, k_t, k_w, k_b = jax.random.split(key, 4)

    # Deterministic parameter init, matching reset_parameters():
    # stdv = 1 / sqrt(weight.size(1)) = 1 / sqrt(input_dim)
    stdv = 1.0 / math.sqrt(D_in)
    weight = jax.random.uniform(
        k_w, (K, D_in, D_out), minval=-stdv, maxval=stdv, dtype=jnp.float32
    )
    bias = jax.random.uniform(
        k_b, (D_out,), minval=-stdv, maxval=stdv, dtype=jnp.float32
    )

    # Example inputs.
    x = jax.random.normal(k_x, (B, V, D_in), dtype=jnp.float32)
    t_k = jax.random.normal(k_t, (K, V, V), dtype=jnp.float32)

    out = graph_convolution(x, t_k, weight, bias)
    out = jax.block_until_ready(out)

    ref = _reference(x, t_k, weight, bias)
    assert out.shape == (B, V, D_out)
    assert jnp.allclose(out, ref, atol=1e-4, rtol=1e-4), "mismatch vs reference"

    print("KERNEL_OK")
</pallas_src>

<mosaic_0001>
module attributes {stable_mosaic.version = 11 : i64} {
  func.func @_gcn_kernel(%arg0: i32, %arg1: i32, %arg2: memref<3x16x16xf32, #tpu.memory_space<vmem>>, %arg3: memref<1x16x16xf32, #tpu.memory_space<vmem>>, %arg4: memref<3x8x32xf32, #tpu.memory_space<vmem>>, %arg5: memref<1x32xf32, #tpu.memory_space<vmem>>, %arg6: memref<2x16x32xf32, #tpu.memory_space<vmem>>) attributes {dimension_semantics = [#tpu.dimension_semantics<parallel>, #tpu.dimension_semantics<parallel>], iteration_bounds = array<i64: 1, 1>, scalar_prefetch = 0 : i64, scratch_operands = 0 : i64, tpu.core_type = #tpu.core_type<tc>, window_params = [{transform_indices = @transform_0, window_bounds = array<i64: 3, 16, 16>}, {transform_indices = @transform_1, window_bounds = array<i64: 1, 16, 16>}, {pipeline_mode = #tpu.pipeline_mode<synchronous>, transform_indices = @transform_2, window_bounds = array<i64: 3, 8, 32>}, {pipeline_mode = #tpu.pipeline_mode<synchronous>, transform_indices = @transform_3, window_bounds = array<i64: 1, 32>}, {transform_indices = @transform_4, window_bounds = array<i64: 2, 16, 32>}]} {
    %c0 = arith.constant 0 : index
    %c0_0 = arith.constant 0 : index
    %c0_1 = arith.constant 0 : index
    %0 = vector.load %arg2[%c0, %c0_0, %c0_1] : memref<3x16x16xf32, #tpu.memory_space<vmem>>, vector<3x16x16xf32>
    %1 = vector.shape_cast %0 : vector<3x16x16xf32> to vector<48x16xf32>
    %c0_2 = arith.constant 0 : index
    %c0_3 = arith.constant 0 : index
    %c0_4 = arith.constant 0 : index
    %2 = vector.load %arg3[%c0_2, %c0_3, %c0_4] : memref<1x16x16xf32, #tpu.memory_space<vmem>>, vector<1x16x16xf32>
    %3 = vector.shape_cast %2 : vector<1x16x16xf32> to vector<16x16xf32>
    %cst = arith.constant dense<0.000000e+00> : vector<48x16xf32>
    %4 = tpu.matmul %1, %3, %cst {dimension_numbers = #tpu.dot_dimension_numbers<[1], [0], [0], [1], [0, 0, 1, 1], [], []>} : vector<48x16xf32>, vector<16x16xf32>, vector<48x16xf32> -> vector<48x16xf32>
    %5 = vector.shape_cast %4 : vector<48x16xf32> to vector<3x16x16xf32>
    %c0_5 = arith.constant 0 : index
    %c0_6 = arith.constant 0 : index
    %c0_7 = arith.constant 0 : index
    %6 = vector.load %arg4[%c0_5, %c0_6, %c0_7] : memref<3x8x32xf32, #tpu.memory_space<vmem>>, vector<3x8x32xf32>
    %c0_8 = arith.constant 0 : index
    %c0_9 = arith.constant 0 : index
    %7 = vector.load %arg5[%c0_8, %c0_9] : memref<1x32xf32, #tpu.memory_space<vmem>>, vector<1x32xf32>
    %8 = vector.extract_strided_slice %5 {offsets = [0, 0, 0], sizes = [3, 16, 8], strides = [1, 1, 1]} : vector<3x16x16xf32> to vector<3x16x8xf32>
    "tpu.trace_start"() <{level = 10 : i32, message = "kvd,kdo->kvo"}> : () -> ()
    %cst_10 = arith.constant dense<0.000000e+00> : vector<3x16x32xf32>
    %9 = tpu.matmul %8, %6, %cst_10 {dimension_numbers = #tpu.dot_dimension_numbers<[2], [1], [1], [2], [0, 0, 0, 1, 1, 2], [0], [0]>} : vector<3x16x8xf32>, vector<3x8x32xf32>, vector<3x16x32xf32> -> vector<3x16x32xf32>
    "tpu.trace_stop"() : () -> ()
    %cst_11 = arith.constant dense<0.000000e+00> : vector<16x32xf32>
    %10 = vector.multi_reduction <add>, %9, %cst_11 [0] : vector<3x16x32xf32> to vector<16x32xf32>
    %11 = vector.broadcast %7 : vector<1x32xf32> to vector<16x32xf32>
    %12 = arith.addf %10, %11 : vector<16x32xf32>
    %c0_12 = arith.constant 0 : index
    %c0_13 = arith.constant 0 : index
    %c0_14 = arith.constant 0 : index
    %13 = vector.load %arg6[%c0_12, %c0_13, %c0_14] : memref<2x16x32xf32, #tpu.memory_space<vmem>>, vector<1x16x32xf32>
    %14 = vector.shape_cast %13 : vector<1x16x32xf32> to vector<16x32xf32>
    %15 = vector.shape_cast %12 : vector<16x32xf32> to vector<1x16x32xf32>
    tpu.vector_store %arg6[%c0_12, %c0_13, %c0_14], %15 {strides = array<i32>} : memref<2x16x32xf32, #tpu.memory_space<vmem>>, vector<1x16x32xf32>,
    %16 = vector.extract_strided_slice %5 {offsets = [0, 0, 8], sizes = [3, 16, 8], strides = [1, 1, 1]} : vector<3x16x16xf32> to vector<3x16x8xf32>
    "tpu.trace_start"() <{level = 10 : i32, message = "kvd,kdo->kvo"}> : () -> ()
    %cst_15 = arith.constant dense<0.000000e+00> : vector<3x16x32xf32>
    %17 = tpu.matmul %16, %6, %cst_15 {dimension_numbers = #tpu.dot_dimension_numbers<[2], [1], [1], [2], [0, 0, 0, 1, 1, 2], [0], [0]>} : vector<3x16x8xf32>, vector<3x8x32xf32>, vector<3x16x32xf32> -> vector<3x16x32xf32>
    "tpu.trace_stop"() : () -> ()
    %cst_16 = arith.constant dense<0.000000e+00> : vector<16x32xf32>
    %18 = vector.multi_reduction <add>, %17, %cst_16 [0] : vector<3x16x32xf32> to vector<16x32xf32>
    %19 = vector.broadcast %7 : vector<1x32xf32> to vector<16x32xf32>
    %20 = arith.addf %18, %19 : vector<16x32xf32>
    %c1 = arith.constant 1 : index
    %c0_17 = arith.constant 0 : index
    %c0_18 = arith.constant 0 : index
    %21 = vector.load %arg6[%c1, %c0_17, %c0_18] : memref<2x16x32xf32, #tpu.memory_space<vmem>>, vector<1x16x32xf32>
    %22 = vector.shape_cast %21 : vector<1x16x32xf32> to vector<16x32xf32>
    %23 = vector.shape_cast %20 : vector<16x32xf32> to vector<1x16x32xf32>
    tpu.vector_store %arg6[%c1, %c0_17, %c0_18], %23 {strides = array<i32>} : memref<2x16x32xf32, #tpu.memory_space<vmem>>, vector<1x16x32xf32>,
    return
  }
  func.func @transform_0(%arg0: i32, %arg1: i32) -> (i32, i32, i32) {
    %c0_i32 = arith.constant 0 : i32
    %c0_i32_0 = arith.constant 0 : i32
    %c0_i32_1 = arith.constant 0 : i32
    return %c0_i32, %arg0, %c0_i32_0 : i32, i32, i32
  }
  func.func @transform_1(%arg0: i32, %arg1: i32) -> (i32, i32, i32) {
    %c0_i32 = arith.constant 0 : i32
    %c0_i32_0 = arith.constant 0 : i32
    %c0_i32_1 = arith.constant 0 : i32
    return %arg1, %c0_i32, %c0_i32_0 : i32, i32, i32
  }
  func.func @transform_2(%arg0: i32, %arg1: i32) -> (i32, i32, i32) {
    %c0_i32 = arith.constant 0 : i32
    %c0_i32_0 = arith.constant 0 : i32
    %c0_i32_1 = arith.constant 0 : i32
    %c0_i32_2 = arith.constant 0 : i32
    return %c0_i32, %c0_i32_0, %c0_i32_1 : i32, i32, i32
  }
  func.func @transform_3(%arg0: i32, %arg1: i32) -> (i32, i32) {
    %c0_i32 = arith.constant 0 : i32
    %c0_i32_0 = arith.constant 0 : i32
    %c0_i32_1 = arith.constant 0 : i32
    return %c0_i32, %c0_i32_0 : i32, i32
  }
  func.func @transform_4(%arg0: i32, %arg1: i32) -> (i32, i32, i32) {
    %c0_i32 = arith.constant 0 : i32
    %c0_i32_0 = arith.constant 0 : i32
    return %arg1, %arg0, %c0_i32 : i32, i32, i32
  }
}

</mosaic_0001>

<bundles_post_ra>
// kernel: graph_convolution.1
= control target key start
LH: loop header
LB: loop body
LE: loop exit
PB: predicated region body
PF: predicated region fallthrough
CT: control target
= control target key end

     0   :  { %9 = vsyncpa [#allocation3], 0  ;;  %s935_s0 = inlined_call_operand.hbm [shape: f32[3,16,16], index: 0, kind: input, shape index: {}]   ;;  %s936_s1 = inlined_call_operand.vmem [shape: f32[1,16,16], index: 1, kind: input, shape index: {}]   ;;  %s937_s2 = inlined_call_operand.vmem [shape: f32[3,8,32], index: 2, kind: input, shape index: {}]   ;;  %s938_s3 = inlined_call_operand.vmem [shape: f32[1,32], index: 3, kind: input, shape index: {}]   ;;  %s939_s4 = inlined_call_operand.hbm [shape: f32[2,16,32], index: 4, kind: output, shape index: {}]  }
   0x1   :  { %10 = vsyncpa [#allocation4], 0  ;;  %s841_s15 = smov [#allocation2]  }
   0x2   :  { %s16_s16 = sshll.u32 %s841_s15, 4  ;;  %s17_s16 = int_to_ptr.vmem [resolvable:$true] %s16_s16 }
   0x3   :  { %s805_s17 = scalar_lea.vmem %s17_s16, 768  ;;  %p810_p1 = scmp.lt.s32.totalorder %s17_s16, %s17_s16 }
   0x4   :  { %p806_p0 = scmp.ne.s32.totalorder %s17_s16, %s805_s17  ;;  %p811_p2 = scmp.lt.s32.totalorder %s805_s17, %s805_s17 }
   0x6   :  { %p812_p3 = por %p811_p2, %p810_p1 }
   0x8   :  { %p813_p4 = pnand %p812_p3, %p806_p0 }
   0xa   :  { %816 = shalt.err (!%p813_p4)
}
   0xb   :  { %s842_s18 = smov 128   ;;  %s843_s19 = smov 8  }
   0xc   :  { %22 = dma.hbm_to_vmem [thread:$0]  %s935_s0, 768, %s17_s16, [#allocation3], %s842_s18, %s842_s18, %s843_s19  }
   0xd   :  { %837 = dma.done.wait [#allocation3], 768  }
   0xe   :  { %838 = vsyncadd [#allocation3], 4294966528  ;;  %vm40_vm0 = vcmask 130048   ;;  %v39_v0 = vld [vmem:[%s936_s1 + $0x8] sm:$0xff]  ;;  %v38_v1 = vld [vmem:[%s936_s1] sm:$0xff]  ;;  %vm158_vm1 = vcmask 64512  }
   0xf   :  { %v32_v2 = vld [vmem:[#allocation2] sm:$0xff]  ;;  %749 = vmatprep.subr.mxu0 %v39_v0  ;;  %v33_v3 = vld [vmem:[#allocation2 + $0x8] sm:$0xff]  ;;  %v34_v4 = vld [vmem:[#allocation2 + $0x10] sm:$0xff]  ;;  %s844_s28 = smov 120   ;;  %vm402_vm2 = vcmask 261120  }
  0x10   :  { %753 = vmatprep.mubr.msk.f32.mxu0 %vm40_vm0, %v32_v2  ;;  %750 = vmatpush3.msra.mxu0 %v39_v0  ;;  %v35_v5 = vld [vmem:[#allocation2 + $0x18] sm:$0xff]  ;;  %v36_v6 = vld [vmem:[#allocation2 + $0x20] sm:$0xff]  ;;  %v37_v7 = vld [vmem:[#allocation2 + $0x28] sm:$0xff] }
  0x11   :  { %751 = vmatprep.subr.mxu0 %v38_v1  ;;  %v154_v8 = vld [vmem:[%s937_s2] sm:$0xff]  ;;  %v155_v9 = vld [vmem:[%s937_s2 + $0x8] sm:$0xff]  ;;  %v156_v13 = vld [vmem:[%s937_s2 + $0x10] sm:$0xff] }
  0x12   :  { %752 = vmatpush3.msra.mxu0 %v38_v1  ;;  %762 = vmatprep.subr.mxu1 %v154_v8  ;;  %v716_v33 = vld [vmem:[%s938_s3] ss:$0 sm:$0xff]  ;;  %s845_s3 = smov [#allocation5]  }
  0x13   :  { %754 = vmatmul.mubr.msk.f32.vlgmr.msra.gmra.mxu0 %vm40_vm0, %v33_v3  ;;  %763 = vmatpush3.msra.mxu1 %v154_v8  ;;  %s692_s6 = sshll.u32 %s845_s3, 4  ;;  %s693_s6 = int_to_ptr.vmem [resolvable:$true] %s692_s6 }
  0x14   :  { %756 = vmatprep.mubr.msk.f32.mxu0 %vm40_vm0, %v34_v4  ;;  %767 = vmatprep.subr.mxu1 %v155_v9  ;;  %s817_s7 = scalar_lea.vmem %s693_s6, 512  ;;  %p822_p6 = scmp.lt.s32.totalorder %s693_s6, %s693_s6 }
  0x15   :  { %782 = vmatprep.subr.mxu0 %v155_v9  ;;  %p818_p5 = scmp.ne.s32.totalorder %s693_s6, %s817_s7  ;;  %p823_p7 = scmp.lt.s32.totalorder %s817_s7, %s817_s7 }
  0x16   :  { %783 = vmatpush3.msra.mxu0 %v155_v9 }
  0x17   :  { %757 = vmatmul.mubr.msk.f32.gmra.mxu0 %vm40_vm0, %v35_v5  ;;  %p824_p8 = por %p823_p7, %p822_p6 }
  0x18   :  { %759 = vmatprep.mubr.msk.f32.mxu0 %vm40_vm0, %v36_v6 }
  0x19   :  { %p825_p9 = pnand %p824_p8, %p818_p5 }
  0x1b   :  { %760 = vmatmul.mubr.msk.f32.gmra.mxu0 %vm40_vm0, %v37_v7 }
  0xd3   :  { %v755_v10 = vpop.f32.mrf.mxu0 }
  0xd4   :  { %425 = vrot.lane.b32.xlu0 %v755_v10, %s844_s28 }
  0xd5   :  { %v125_v11 = vpop.f32.mrf.mxu0 }
  0xd6   :  { %764 = vmatprep.mubr.msk.f32.mxu1 %vm158_vm1, %v125_v11 }
  0xd7   :  { %v758_v12 = vpop.f32.mrf.mxu0  ;;  %765 = vmatmul.mubr.msk.f32.vlgmr.msra.gmra.mxu1 %vm158_vm1, %v755_v10 }
  0xd8   :  { %423 = vrot.lane.b32.xlu0 %v125_v11, %s844_s28  ;;  %508 = vrot.lane.b32.xlu1 %v758_v12, %s844_s28 }
  0xd9   :  { %v135_v14 = vpop.f32.mrf.mxu0  ;;  %768 = vmatpush3.msra.mxu1 %v155_v9 }
  0xda   :  { %769 = vmatprep.mubr.msk.f32.mxu1 %vm158_vm1, %v135_v14  ;;  %772 = vmatprep.subr.mxu1 %v156_v13 }
  0xdb   :  { %v761_v15 = vpop.f32.mrf.mxu0  ;;  %770 = vmatmul.mubr.msk.f32.vlgmr.msra.gmra.mxu1 %vm158_vm1, %v758_v12 }
  0xdc   :  { %506 = vrot.lane.b32.xlu1 %v135_v14, %s844_s28  ;;  %773 = vmatpush3.msra.mxu1 %v156_v13 }
  0xdd   :  { %v145_v16 = vpop.f32.mrf.mxu0  ;;  %777 = vmatprep.subr.mxu1 %v154_v8 }
  0xde   :  { %589 = vrot.lane.b32.xlu0 %v145_v16, %s844_s28  ;;  %774 = vmatprep.mubr.msk.f32.mxu1 %vm158_vm1, %v145_v16 }
  0xdf   :  { %775 = vmatmul.mubr.msk.f32.vlgmr.msra.gmra.mxu1 %vm158_vm1, %v761_v15 }
  0xe0   :  { %591 = vrot.lane.b32.xlu1 %v761_v15, %s844_s28  ;;  %778 = vmatpush3.msra.mxu1 %v154_v8 }
  0xe1   :  { %787 = vmatprep.subr.mxu1 %v156_v13 }
 0x146   :  { %v426_v17 = vpop.permute.xlu0 %425 }
 0x14a   :  { %v424_v18 = vpop.permute.xlu0 %423  ;;  %v509_v19 = vpop.permute.xlu1 %508 }
 0x14b   :  { %779 = vmatprep.mubr.msk.f32.mxu1 %vm158_vm1, %v424_v18 }
 0x14c   :  { %780 = vmatmul.mubr.msk.f32.vlgmr.msra.gmra.mxu1 %vm158_vm1, %v426_v17 }
 0x14d   :  { %788 = vmatpush3.msra.mxu1 %v156_v13 }
 0x14e   :  { %v507_v20 = vpop.permute.xlu1 %506 }
 0x14f   :  { %784 = vmatprep.mubr.msk.f32.mxu0 %vm158_vm1, %v507_v20 }
 0x150   :  { %785 = vmatmul.mubr.msk.f32.vlgmr.msra.gmra.mxu0 %vm158_vm1, %v509_v19  ;;  %v590_v21 = vpop.permute.xlu0 %589 }
 0x151   :  { %789 = vmatprep.mubr.msk.f32.mxu1 %vm158_vm1, %v590_v21 }
 0x152   :  { %v592_v22 = vpop.permute.xlu1 %591 }
 0x153   :  { %790 = vmatmul.mubr.msk.f32.vlgmr.msra.gmra.mxu1 %vm158_vm1, %v592_v22 }
 0x197   :  { %v766_v23 = vpop.f32.mrf.mxu1 }
 0x198   :  { %v408_v28 = vsel %vm402_vm2, %v766_v23, 0.0 }
 0x199   :  { %v231_v24 = vpop.f32.mrf.mxu1 }
 0x19a   :  { %v403_v32 = vsel %vm402_vm2, %v231_v24, 0.0 }
 0x19b   :  { %v771_v25 = vpop.f32.mrf.mxu1 }
 0x19c   :  { %v409_v26 = vsel %vm402_vm2, %v771_v25, 0.0 }
 0x19d   :  { %v312_v27 = vpop.f32.mrf.mxu1  ;;  %v410_v30 = vadd.f32 %v409_v26, %v408_v28 }
 0x19e   :  { %v404_v29 = vsel %vm402_vm2, %v312_v27, 0.0 }
 0x19f   :  { %v776_v31 = vpop.f32.mrf.mxu1  ;;  %v405_v35 = vadd.f32 %v404_v29, %v403_v32 }
 0x1a0   :  { %v411_v34 = vsel %vm402_vm2, %v776_v31, 0.0 }
 0x1a1   :  { %v412_v36 = vadd.f32 %v411_v34, %v410_v30  ;;  %v393_v37 = vpop.f32.mrf.mxu1 }
 0x1a2   :  { %v406_v38 = vsel %vm402_vm2, %v393_v37, 0.0 }
 0x1a3   :  { %v420_v39 = vadd.f32 %v716_v33, %v412_v36  ;;  %v407_v40 = vadd.f32 %v406_v38, %v405_v35 }
 0x1a5   :  { %422 = vst.msk [vmem:[#allocation5 + $0x8] sm:$0xff] %vm402_vm2, %v420_v39  ;;  %v419_v41 = vadd.f32 %v716_v33, %v407_v40 }
 0x1a7   :  { %421 = vst.msk [vmem:[#allocation5] sm:$0xff] %vm402_vm2, %v419_v41 }
 0x20c   :  { %v781_v42 = vpop.f32.mrf.mxu1 }
 0x20d   :  { %v677_v45 = vsel %vm402_vm2, %v781_v42, 0.0 }
 0x20e   :  { %v497_v43 = vpop.f32.mrf.mxu1 }
 0x20f   :  { %v672_v49 = vsel %vm402_vm2, %v497_v43, 0.0 }
 0x210   :  { %v786_v44 = vpop.f32.mrf.mxu0 }
 0x211   :  { %v678_v46 = vsel %vm402_vm2, %v786_v44, 0.0 }
 0x212   :  { %v679_v47 = vadd.f32 %v678_v46, %v677_v45  ;;  %v580_v48 = vpop.f32.mrf.mxu0 }
 0x213   :  { %v673_v50 = vsel %vm402_vm2, %v580_v48, 0.0  ;;  %v791_v51 = vpop.f32.mrf.mxu1 }
 0x214   :  { %v674_v52 = vadd.f32 %v673_v50, %v672_v49  ;;  %v680_v53 = vsel %vm402_vm2, %v791_v51, 0.0 }
 0x215   :  { %v681_v54 = vadd.f32 %v680_v53, %v679_v47  ;;  %v663_v55 = vpop.f32.mrf.mxu1 }
 0x216   :  { %v675_v56 = vsel %vm402_vm2, %v663_v55, 0.0 }
 0x217   :  { %v683_v57 = vadd.f32 %v716_v33, %v681_v54  ;;  %v676_v58 = vadd.f32 %v675_v56, %v674_v52 }
 0x219   :  { %686 = vst.msk [vmem:[#allocation5 + $0x18] sm:$0xff] %vm402_vm2, %v683_v57  ;;  %v682_v59 = vadd.f32 %v716_v33, %v676_v58 }
 0x21b   :  { %685 = vst.msk [vmem:[#allocation5 + $0x10] sm:$0xff] %vm402_vm2, %v682_v59 }
 0x21c   :  { %828 = shalt.err (!%p825_p9)
}
 0x21d   :  { %698 = dma.vmem_to_hbm [thread:$0]  %s693_s6, 512, %s939_s4, [#allocation4], %s842_s18, %s842_s18, %s843_s19  }
 0x21e   :  { %839 = dma.done.wait [#allocation4], 512  }
 0x21f   :  { %840 = vsyncadd [#allocation4], 4294966784 }
 0x220   :  { %702 = vsyncpa [#allocation3], 1 }
 0x221   :  { %703 = vsyncpa [#allocation4], 1 }

</bundles_post_ra>
